<compile_context>
chip_gen: v5e
topology: v5e:2x2
jax: 0.10.0
libtpu: 0.0.40
codegen_flags: <defaults>
</compile_context>

<pallas_src>
import jax
import jax.numpy as jnp
from jax.experimental import pallas as pl
from jax.experimental.pallas import tpu as pltpu


def _round_up(a, b):
    return ((a + b - 1) // b) * b


# ----------------------------- kernels --------------------------------------
def _make_router_kernel(num_experts, expert_capacity):
    def router_kernel(x_ref, wr_ref, sel_ref):
        # x: (TILE_T, H) bf16, wr: (H, 128) bf16 (zero-padded past num_experts)
        logits = jnp.dot(x_ref[...], wr_ref[...],
                         preferred_element_type=jnp.float32)      # (TILE_T, 128)
        lane = jax.lax.broadcasted_iota(jnp.int32, logits.shape, 1)
        neg = jnp.float32(-1e30)
        logits = jnp.where(lane < num_experts, logits, neg)        # mask padded lanes

        # Fused top-k: iteratively pick the argmax (lowest-index tie-break,
        # matching jax.lax.top_k), mask it out; the token's "winning" expert
        # is the max index among the k picks (reference overwrite semantics).
        sel = jnp.full((logits.shape[0], 1), -1, jnp.int32)
        for _ in range(expert_capacity):
            m = jnp.max(logits, axis=-1, keepdims=True)            # (T, 1)
            is_max = logits == m
            idx = jnp.min(jnp.where(is_max, lane, num_experts),
                          axis=-1, keepdims=True)                  # (T, 1)
            sel = jnp.maximum(sel, idx)
            logits = jnp.where(lane == idx, neg, logits)
        sel_ref[...] = sel
    return router_kernel


def _make_expert_kernel(num_experts):
    def expert_kernel(cnt_ref, fetch_ref, sel_ref, x_ref, w1_ref, w2_ref,
                      out_ref):
        # grid = (token_tiles, experts); expert axis innermost ("arbitrary").
        # out block index is constant across e -> output stays resident in
        # VMEM over the whole expert loop; written back once per token tile.
        t = pl.program_id(0)
        e = pl.program_id(1)

        @pl.when(e == 0)
        def _():
            out_ref[...] = jnp.zeros_like(out_ref)

        # Skip the dense MLP entirely if no token in this tile picked expert e
        # (mirrors torch's `if expert_mask.any()` guard).  The w1/w2 weight
        # DMA for this step was already elided via the fetch_ref index_maps.
        @pl.when(cnt_ref[t * num_experts + e] > 0)
        def _():
            x = x_ref[...]                                   # (TILE_T, H) bf16
            h = jnp.dot(x, w1_ref[...],                      # (H, I) bf16
                        preferred_element_type=jnp.float32)  # f32 acc
            h = h * jax.nn.sigmoid(h)                        # SiLU in f32
            y = jnp.dot(h.astype(jnp.bfloat16), w2_ref[...],  # (I, H) bf16
                        preferred_element_type=jnp.float32)
            mask = jnp.broadcast_to(sel_ref[...] == e, y.shape)
            pltpu.store(out_ref, y.astype(out_ref.dtype), mask=mask)
    return expert_kernel


# ----------------------------- wrapper ---------------------------------------
def moe_forward(x, router_w_t, w1_stack, w2_stack, expert_capacity, *,
                tile_t=512):
    """x: (B, S, H); router_w_t: (H, E) (pre-transposed stored layout);
    w1_stack: (E, H, I); w2_stack: (E, I, H)."""
    B, S, H = x.shape
    T = B * S
    E, _, I = w1_stack.shape
    xf = x.reshape(T, H)

    # ---- token tiling / padding ------------------------------------------
    if T <= tile_t:
        # keep >= 2 token tiles when possible so both v7x TensorCores get work
        tile_t = max(8, _round_up(pl.cdiv(T, 2), 8))
    T_pad = _round_up(T, tile_t)
    num_tiles = T_pad // tile_t

    x_bf = xf.astype(jnp.bfloat16)
    if T_pad != T:
        x_bf = jnp.zeros((T_pad, H), jnp.bfloat16).at[:T].set(x_bf)

    # ---- router: token-tiled, bf16 MXU operands, fused top-k --------------
    E_pad = 128
    wr_bf = jnp.zeros((H, E_pad), jnp.bfloat16).at[:, :E].set(
        router_w_t.astype(jnp.bfloat16))
    sel_router = pl.pallas_call(
        _make_router_kernel(E, expert_capacity),
        out_shape=jax.ShapeDtypeStruct((T_pad, 1), jnp.int32),
        grid=(num_tiles,),
        in_specs=[pl.BlockSpec((tile_t, H), lambda t: (t, 0)),
                  pl.BlockSpec((H, E_pad), lambda t: (0, 0))],
        out_specs=pl.BlockSpec((tile_t, 1), lambda t: (t, 0)),
        compiler_params=pltpu.CompilerParams(dimension_semantics=("parallel",)),
    )(x_bf, wr_bf)

    # Padded tokens must never be counted as routed to any expert.
    valid = (jnp.arange(T_pad, dtype=jnp.int32) < T)[:, None]
    sel2d = jnp.where(valid, sel_router, -1).astype(jnp.int32)      # (T_pad, 1)

    # per-(tile, expert) token counts -> SMEM scalar prefetch (flattened 1D),
    # enables the pl.when compute skip in the kernel.
    counts = (sel2d.reshape(num_tiles, tile_t, 1)
              == jnp.arange(E, dtype=jnp.int32)).sum(axis=1)        # (tiles, E)
    counts_flat = counts.reshape(-1).astype(jnp.int32)

    # fetch_idx[step] = expert index to DMA for this grid step; for empty
    # steps it repeats the previous step's index so Pallas elides the w1/w2
    # weight fetch entirely (compute is skipped anyway).
    n_steps = num_tiles * E
    pos = jnp.arange(n_steps, dtype=jnp.int32)
    marker = jnp.where(counts_flat > 0, pos, -1)
    last_nonempty = jax.lax.cummax(marker)
    fetch_idx = jnp.where(last_nonempty >= 0,
                          last_nonempty % E, 0).astype(jnp.int32)

    # bf16 matmul operands (f32 accumulation inside the kernel).
    # TODO(synk): on v7x, fp8 expert weights would halve weight HBM/VMEM; kept
    # bf16 for cross-generation accuracy/compatibility.
    w1_bf = w1_stack.astype(jnp.bfloat16)
    w2_bf = w2_stack.astype(jnp.bfloat16)

    out_itemsize = jnp.dtype(x.dtype).itemsize
    vmem_need = 2 * (tile_t * H * 2            # x block (bf16), double-buffered
                     + tile_t * 4              # sel block
                     + H * I * 2 + I * H * 2   # w1 + w2 blocks (bf16)
                     + tile_t * H * out_itemsize)
    vmem_limit = int(min(max(vmem_need + (4 << 20), 16 << 20), 60 << 20))

    cost = pl.CostEstimate(
        flops=2 * T_pad * E * (H * I + I * H),
        transcendentals=T_pad * E * I,
        bytes_accessed=(x_bf.size * 2 + w1_bf.size * 2 + w2_bf.size * 2
                        + sel2d.size * 4 + T_pad * H * out_itemsize),
    )

    # TODO(synk): a production MoE would gather/group tokens per expert instead
    # of dense compute + mask; kept dense to preserve the module's
    # "largest selected expert overwrites" semantics exactly.
    out = pl.pallas_call(
        _make_expert_kernel(E),
        out_shape=jax.ShapeDtypeStruct((T_pad, H), x.dtype),
        grid_spec=pltpu.PrefetchScalarGridSpec(
            num_scalar_prefetch=2,
            grid=(num_tiles, E),
            in_specs=[
                pl.BlockSpec((tile_t, 1), lambda t, e, cnt, fi: (t, 0)),
                pl.BlockSpec((tile_t, H), lambda t, e, cnt, fi: (t, 0)),
                pl.BlockSpec((None, H, I),
                             lambda t, e, cnt, fi: (fi[t * E + e], 0, 0)),
                pl.BlockSpec((None, I, H),
                             lambda t, e, cnt, fi: (fi[t * E + e], 0, 0)),
            ],
            out_specs=pl.BlockSpec((tile_t, H), lambda t, e, cnt, fi: (t, 0)),
        ),
        compiler_params=pltpu.CompilerParams(
            dimension_semantics=("parallel", "arbitrary"),
            vmem_limit_bytes=vmem_limit),
        cost_estimate=cost,
    )(counts_flat, fetch_idx, sel2d, x_bf, w1_bf, w2_bf)

    return out[:T].reshape(B, S, H)


# -------------------------- pure-JAX reference -------------------------------
def ref_forward(x, router_w_t, w1_stack, w2_stack, expert_capacity):
    """Mirrors the torch module semantics and the kernel's precision choices
    (bf16 MXU operands everywhere with f32 accumulation)."""
    B, S, H = x.shape
    xf = x.reshape(-1, H)
    x_bf = xf.astype(jnp.bfloat16)
    logits = jnp.dot(x_bf, router_w_t.astype(jnp.bfloat16),
                     preferred_element_type=jnp.float32)
    probs = jax.nn.softmax(logits, axis=-1)
    top_k_weights, idx = jax.lax.top_k(probs, expert_capacity)
    _ = top_k_weights / jnp.sum(top_k_weights, axis=-1, keepdims=True)  # unused (matches torch)
    out = jnp.zeros((xf.shape[0], H), jnp.float32)
    for i in range(w1_stack.shape[0]):
        mask = jnp.any(idx == i, axis=-1)
        h = jnp.dot(x_bf, w1_stack[i].astype(jnp.bfloat16),
                    preferred_element_type=jnp.float32)
        h = h * jax.nn.sigmoid(h)
        y = jnp.dot(h.astype(jnp.bfloat16), w2_stack[i].astype(jnp.bfloat16),
                    preferred_element_type=jnp.float32)
        out = jnp.where(mask[:, None], y, out)
    return out.reshape(B, S, H).astype(x.dtype)


# ------------------------------- main -----------------------------------------
if __name__ == "__main__":
    batch, seq = 2, 8
    hidden_size = 128
    intermediate_size = 256
    num_experts = 4
    expert_capacity = 2

    key = jax.random.PRNGKey(0)
    k_x, k_r, k_w1, k_w2 = jax.random.split(key, 4)

    x = jax.random.normal(k_x, (batch, seq, hidden_size), dtype=jnp.float32)
    # Stored parameter layouts: router already (H, E); expert weights already
    # pre-transposed per expert so the kernel computes x @ W (== torch x @ W.T).
    router_w_t = 0.05 * jax.random.normal(
        k_r, (hidden_size, num_experts), jnp.float32)
    w1_stack = 0.05 * jax.random.normal(
        k_w1, (num_experts, hidden_size, intermediate_size), jnp.float32)
    w2_stack = 0.05 * jax.random.normal(
        k_w2, (num_experts, intermediate_size, hidden_size), jnp.float32)

    out = moe_forward(x, router_w_t, w1_stack, w2_stack, expert_capacity)
    out = jax.block_until_ready(out)

    ref = ref_forward(x, router_w_t, w1_stack, w2_stack, expert_capacity)
    assert out.shape == (batch, seq, hidden_size)
    assert jnp.allclose(out, ref, atol=2e-3, rtol=2e-3), "mismatch vs reference"

    print("KERNEL_OK")
</pallas_src>

<mosaic_0001>
module attributes {stable_mosaic.version = 11 : i64} {
  func.func @router_kernel(%arg0: i32, %arg1: memref<8x128xbf16, #tpu.memory_space<vmem>>, %arg2: memref<128x128xbf16, #tpu.memory_space<vmem>>, %arg3: memref<8x1xi32, #tpu.memory_space<vmem>>) attributes {dimension_semantics = [#tpu.dimension_semantics<parallel>], iteration_bounds = array<i64: 2>, scalar_prefetch = 0 : i64, scratch_operands = 0 : i64, tpu.core_type = #tpu.core_type<tc>, window_params = [{transform_indices = @transform_0, window_bounds = array<i64: 8, 128>}, {pipeline_mode = #tpu.pipeline_mode<synchronous>, transform_indices = @transform_1, window_bounds = array<i64: 128, 128>}, {transform_indices = @transform_2, window_bounds = array<i64: 8, 1>}]} {
    %c0 = arith.constant 0 : index
    %c0_0 = arith.constant 0 : index
    %0 = vector.load %arg1[%c0, %c0_0] : memref<8x128xbf16, #tpu.memory_space<vmem>>, vector<8x128xbf16>
    %c0_1 = arith.constant 0 : index
    %c0_2 = arith.constant 0 : index
    %1 = vector.load %arg2[%c0_1, %c0_2] : memref<128x128xbf16, #tpu.memory_space<vmem>>, vector<128x128xbf16>
    %cst = arith.constant dense<0.000000e+00> : vector<8x128xf32>
    %2 = tpu.matmul %0, %1, %cst {dimension_numbers = #tpu.dot_dimension_numbers<[1], [0], [0], [1], [0, 0, 1, 1], [], []>} : vector<8x128xbf16>, vector<128x128xbf16>, vector<8x128xf32> -> vector<8x128xf32>
    %3 = tpu.iota {dimensions = array<i32: 1>} : vector<8x128xi32>
    %c4_i32 = arith.constant 4 : i32
    %4 = vector.broadcast %c4_i32 : i32 to vector<8x128xi32>
    %5 = arith.cmpi slt, %3, %4 : vector<8x128xi32>
    %cst_3 = arith.constant -1.000000e+30 : f32
    %6 = vector.broadcast %cst_3 : f32 to vector<8x128xf32>
    %7 = arith.select %5, %2, %6 : vector<8x128xi1>, vector<8x128xf32>
    %c-1_i32 = arith.constant -1 : i32
    %8 = vector.broadcast %c-1_i32 : i32 to vector<8x1xi32>
    %cst_4 = arith.constant dense<0xFF800000> : vector<8xf32>
    %9 = vector.multi_reduction <maximumf>, %7, %cst_4 [1] : vector<8x128xf32> to vector<8xf32>
    %10 = vector.shape_cast %9 : vector<8xf32> to vector<8x1xf32>
    %11 = vector.broadcast %10 : vector<8x1xf32> to vector<8x128xf32>
    %12 = arith.cmpf oeq, %7, %11 : vector<8x128xf32>
    %c4_i32_5 = arith.constant 4 : i32
    %13 = vector.broadcast %c4_i32_5 : i32 to vector<8x128xi32>
    %14 = arith.select %12, %3, %13 : vector<8x128xi1>, vector<8x128xi32>
    %cst_6 = arith.constant dense<2147483647> : vector<8xi32>
    %15 = vector.multi_reduction <minsi>, %14, %cst_6 [1] : vector<8x128xi32> to vector<8xi32>
    %16 = vector.shape_cast %15 : vector<8xi32> to vector<8x1xi32>
    %17 = arith.maxsi %8, %16 : vector<8x1xi32>
    %18 = vector.broadcast %16 : vector<8x1xi32> to vector<8x128xi32>
    %19 = arith.cmpi eq, %3, %18 : vector<8x128xi32>
    %cst_7 = arith.constant -1.000000e+30 : f32
    %20 = vector.broadcast %cst_7 : f32 to vector<8x128xf32>
    %21 = arith.select %19, %20, %7 : vector<8x128xi1>, vector<8x128xf32>
    %cst_8 = arith.constant dense<0xFF800000> : vector<8xf32>
    %22 = vector.multi_reduction <maximumf>, %21, %cst_8 [1] : vector<8x128xf32> to vector<8xf32>
    %23 = vector.shape_cast %22 : vector<8xf32> to vector<8x1xf32>
    %24 = vector.broadcast %23 : vector<8x1xf32> to vector<8x128xf32>
    %25 = arith.cmpf oeq, %21, %24 : vector<8x128xf32>
    %c4_i32_9 = arith.constant 4 : i32
    %26 = vector.broadcast %c4_i32_9 : i32 to vector<8x128xi32>
    %27 = arith.select %25, %3, %26 : vector<8x128xi1>, vector<8x128xi32>
    %cst_10 = arith.constant dense<2147483647> : vector<8xi32>
    %28 = vector.multi_reduction <minsi>, %27, %cst_10 [1] : vector<8x128xi32> to vector<8xi32>
    %29 = vector.shape_cast %28 : vector<8xi32> to vector<8x1xi32>
    %30 = arith.maxsi %17, %29 : vector<8x1xi32>
    %c0_11 = arith.constant 0 : index
    %c0_12 = arith.constant 0 : index
    %31 = vector.load %arg3[%c0_11, %c0_12] : memref<8x1xi32, #tpu.memory_space<vmem>>, vector<8x1xi32>
    tpu.vector_store %arg3[%c0_11, %c0_12], %30 {strides = array<i32>} : memref<8x1xi32, #tpu.memory_space<vmem>>, vector<8x1xi32>,
    return
  }
  func.func @transform_0(%arg0: i32) -> (i32, i32) {
    %c0_i32 = arith.constant 0 : i32
    %c0_i32_0 = arith.constant 0 : i32
    return %arg0, %c0_i32 : i32, i32
  }
  func.func @transform_1(%arg0: i32) -> (i32, i32) {
    %c0_i32 = arith.constant 0 : i32
    %c0_i32_0 = arith.constant 0 : i32
    %c0_i32_1 = arith.constant 0 : i32
    return %c0_i32, %c0_i32_0 : i32, i32
  }
  func.func @transform_2(%arg0: i32) -> (i32, i32) {
    %c0_i32 = arith.constant 0 : i32
    %c0_i32_0 = arith.constant 0 : i32
    return %arg0, %c0_i32 : i32, i32
  }
}

</mosaic_0001>

<bundles_post_ra>
// kernel: tpu_custom_call.1
= control target key start
LH: loop header
LB: loop body
LE: loop exit
PB: predicated region body
PF: predicated region fallthrough
CT: control target
= control target key end

     0   :  { %7 = vsyncpa [#allocation3], 0  ;;  %s704_s0 = inlined_call_operand.hbm [shape: bf16[16,128], index: 0, kind: input, shape index: {}]   ;;  %s705_s1 = inlined_call_operand.hbm [shape: bf16[128,128], index: 1, kind: input, shape index: {}]   ;;  %s706_s2 = inlined_call_operand.vmem [shape: s32[16,1], index: 2, kind: output, shape index: {}]  }
   0x1   :  { %9 = vsyncpa [#allocation3 + $0x1], 0 }
   0x2   :  { %10 = vsyncpa [#allocation5], 0  ;;  %s601_s9 = smov 0   ;;  %s603_s10 = smov 0  }
   0x3   :  { %s605_s11 = smov 0   ;;  %s607_s12 = smov 0  }
   0x4 LB: > { %s105_s15 = sshll.u32 %s705_s1, 4  ;;  %s623_s16 = sadd.s32 4294967295, %s581_s12   ;;  %s581_s12 = sphi %s607_s12, %s713_s12   ;;  %s577_s11 = sphi %s605_s11, %s712_s11   ;;  %s573_s10 = sphi %s603_s10, %s711_s10   ;;  %s569_s9 = sphi %s601_s9, %s710_s9   ;;  %s106_s15 = int_to_ptr.hbm [resolvable:$true] %s105_s15 }
   0x5   : > { %p380_p0 = scmp.ge.s32.totalorder %s581_s12, 1  ;;  %p37_p1 = scmp.eq.s32.totalorder %s623_s16, 0 }
   0x6   : > { %p94_p2 = scmp.lt.s32.totalorder %s581_s12, 3  ;;  %s583_s18 = smov [#allocation4]  }
   0x7   : > { %s107_s19 = sshll.u32 %s583_s18, 4  ;;  %s584_s20 = smov 64   ;;  %s108_s19 = int_to_ptr.vmem [resolvable:$true] %s107_s19 }
   0x8   : > { %p628_p3 = pnand %p380_p0, %p94_p2  ;;  %s585_s21 = smov 4  }
   0x9   : > { %s637_s22 = sadd.s32 1, %s581_s12   ;;  %s23_s24 = sadd.s32 1, %s577_s11 }
   0xa   : > { %p437_p4 = pneg %p628_p3  ;;  %s20_s23 = ssub.s32 %s581_s12, %s637_s22 }
   0xb   : > { %p21_p6 = scmp.eq.s32.totalorder %s20_s23, 0  ;;  %p30_p7 = scmp.ne.s32.totalorder %s577_s11, %s573_s10 }
   0xc   : > { %p438_p5 = pnand %p437_p4, %p37_p1  ;;  %p31_p8 = scmp.eq.s32.totalorder %s581_s12, 0 }
   0xd   : > { %p36_p9 = scmp.ne.s32.totalorder %s573_s10, %s569_s9  ;;  %p446_p12 = scmp.lt.s32.totalorder %s581_s12, 2 }
   0xe   : > { %440 = dma.hbm_to_vmem [thread:$0]  (!%p438_p5), %s106_s15, 1024, %s108_s19, [#allocation5], %s584_s20, %s584_s20, %s585_s21  }
   0xf   : > { %s647_s25 = scalar_select %p21_p6, %s577_s11, %s23_s24  }
  0x10   : > { %p32_p10 = por %p31_p8, %p30_p7  ;;  %p651_p11 = por %p37_p1, %p36_p9 }
  0x11   : > { %s121_s27 = sand.u32 1, %s577_s11   ;;  %s384_s29 = sshll.u32 %s581_s12, 2 }
  0x12   : > { %s383_s28 = sshll.u32 %s121_s27, 2  ;;  %s129_s4 = scalar_lea.hbm %s704_s0, %s384_s29 }
  0x13   : > { %s125_s5 = scalar_lea.vmem [#allocation2], %s383_s28  ;;  %s131_s7 = sshll.u32 %s129_s4, 4  ;;  %s132_s7 = int_to_ptr.hbm [resolvable:$true] %s131_s7 }
  0x14   : > { %s133_s6 = sshll.u32 %s125_s5, 4  ;;  %p661_p13 = pnand %p446_p12, %p32_p10  ;;  %s134_s6 = int_to_ptr.vmem [resolvable:$true] %s133_s6 }
  0x15   : > { %s122_s9 = scalar_lea.sflag [#allocation3], %s121_s27  ;;  %s513_s13 = sshra.s32 %s132_s7, 4  ;;  %s514_s13 = int_to_ptr.hbm [resolvable:$true] %s513_s13 }
  0x16   : > { %s515_s14 = scalar_lea.hbm %s514_s13, 4  ;;  %p517_p2 = pneg %p661_p13 }
  0x17   : > { %p516_p0 = scmp.ne.s32.totalorder %s514_s13, %s515_s14  ;;  %s520_s18 = scalar_lea.hbm %s704_s0, 8 }
  0x18   : > { %p521_p6 = scmp.lt.s32.totalorder %s514_s13, %s704_s0  ;;  %p522_p7 = scmp.lt.s32.totalorder %s520_s18, %s515_s14 }
  0x19   : > { %p518_p4 = pnand %p517_p2, %p516_p0 }
  0x1a   : > { %p523_p8 = por %p522_p7, %p521_p6 }
  0x1b   : > { %p519_p5 = pneg %p518_p4 }
  0x1d   : > { %p524_p9 = pnand %p523_p8, %p519_p5 }
  0x1f   : > { %527 = shalt.err (!%p524_p9)
}
  0x20   : > { %444 = dma.hbm_to_vmem [thread:$0]  (!%p661_p13), %s132_s7, 64, %s134_s6, %s122_s9  }
  0x21   : > { %142 = sbr.rel (%p628_p3) target bundleno = 925 (0x39d), region = 28  ;;  %s144_s21 = sand.u32 (!%p628_p3), 1, %s573_s10  }
  0x22   : > { %s386_s23 = sshll.u32 (!%p628_p3), %s144_s21, 2  ;;  %s145_s24 = scalar_lea.sflag (!%p628_p3), [#allocation3], %s144_s21 }
  0x23   : > { %s148_s27 = scalar_lea.vmem (!%p628_p3), [#allocation2], %s386_s23 }
  0x26   : > { %560 = dma.done.wait (%p651_p11), %s145_s24, 64  }
  0x27   : > { %562 = vsyncadd (%p651_p11), %s145_s24, 4294967232 }
  0x28   : > { %564 = dma.done.wait (%p37_p1), [#allocation5], 1024  }
  0x29   : > { %566 = vsyncadd (%p37_p1), [#allocation5], 4294966272  ;;  %v430_v0 = vld [vmem:[#allocation4 + $0x38] sm:$0xff]  ;;  %v429_v1 = vld [vmem:[#allocation4 + $0x30] sm:$0xff]  ;;  %v256_v9 = vlaneseq  ;;  %p174_p1 = scmp.lt.s32.totalorder %s623_s16, 1  ;;  %vm302_vm7 = vcmask 7168  }
  0x2a   : > { %243 = vmatpush.bf16.msra.mxu0 %v430_v0  ;;  %v428_v2 = vld [vmem:[#allocation4 + $0x28] sm:$0xff]  ;;  %v427_v3 = vld [vmem:[#allocation4 + $0x20] sm:$0xff]  ;;  %v426_v4 = vld [vmem:[#allocation4 + $0x18] sm:$0xff] }
  0x2b   : > { %v425_v5 = vld [vmem:[#allocation4 + $0x10] sm:$0xff]  ;;  %v424_v6 = vld [vmem:[#allocation4 + $0x8] sm:$0xff]  ;;  %v423_v7 = vld [vmem:[#allocation4] sm:$0xff]  ;;  %v257_v10 = vand.u32 127, %v256_v9  ;;  %s715_s16 = smov (!%p174_p1, %s623_s16), 1 }
  0x2c   : > { %v178_v8 = vld [vmem:[%s148_s27] sm:$0xf]  ;;  %s388_s17 = sshll.u32 %s715_s16, 3 }
  0x2d   : > { %vm258_vm0 = vcmp.lt.s32.totalorder %v257_v10, 4  ;;  %s177_s29 = scalar_lea.vmem %s706_s2, %s388_s17 }
  0x2e   : > { %244 = vmatpush.bf16.msra.mxu0 %v429_v1 }
  0x32   : > { %245 = vmatpush.bf16.msra.mxu0 %v428_v2 }
  0x36   : > { %246 = vmatpush.bf16.msra.mxu0 %v427_v3 }
  0x3a   : > { %247 = vmatpush.bf16.msra.mxu0 %v426_v4 }
  0x3e   : > { %248 = vmatpush.bf16.msra.mxu0 %v425_v5 }
  0x42   : > { %249 = vmatpush.bf16.msra.mxu0 %v424_v6 }
  0x46   : > { %250 = vmatpush.bf16.msra.mxu0 %v423_v7 }
  0x49   : > { %251 = vmatmul.bf16.vlgmr.msra.gmra.mxu0 %v178_v8 }
  0xc6   : > { %v252_v11 = vpop.f32.mrf.mxu0 }
  0xc7   : > { %v259_v12 = vsel %vm258_vm0, %v252_v11, -1e+30 }
  0xc8   : > { %260 = vmax.xlane.f32.xlu0 %v259_v12 }
  0xce   : > { %v254_v13 = vpop.f32.mrf.mxu0 }
 0x13b   : > { %v261_v14 = vpop.xlane.xlu0 %260 }
 0x13c   : > { %vm262_vm1 = vcmp.eq.f32.partialorder %v259_v12, %v261_v14 }
 0x13d   : > { %v263_v15 = vsel %vm262_vm1, %v257_v10, 4 }
 0x13e   : > { %v265_v16 = vshra.s32 %v263_v15, 16  ;;  %v264_v18 = vand.u32 65535, %v263_v15 }
 0x140   : > { %v267_v17 = vcvt.s32.f32 %v265_v16  ;;  %v266_v20 = vcvt.s32.f32 %v264_v18 }
 0x142   : > { %268 = vmin.xlane.f32.xlu0 %v267_v17 }
 0x1b5   : > { %v269_v19 = vpop.xlane.xlu0 %268 }
 0x1b6   : > { %vm270_vm2 = vcmp.eq.f32.partialorder %v267_v17, %v269_v19  ;;  %v275_v22 = vcvt.f32.s32 %v269_v19 }
 0x1b7   : > { %v271_v21 = vsel %vm270_vm2, %v266_v20, inf }
 0x1b8   : > { %272 = vmin.xlane.f32.xlu1 %v271_v21  ;;  %v276_v24 = vshll.u32 %v275_v22, 16 }
 0x22b   : > { %v273_v23 = vpop.xlane.xlu1 %272 }
 0x22c   : > { %v274_v25 = vcvt.f32.s32 %v273_v23 }
 0x22e   : > { %v277_v26 = vadd.s32 %v276_v24, %v274_v25 }
 0x230   : > { %vm280_vm3 = vcmp.eq.s32.totalorder %v257_v10, %v277_v26  ;;  %vm278_vm6 = vcmp.gt.s32.totalorder %v277_v26, 4294967295 }
 0x231   : > { %v281_v27 = vsel %vm280_vm3, -1e+30, %v259_v12  ;;  %v279_v41 = vsel %vm278_vm6, %v277_v26, 4294967295 }
 0x232   : > { %282 = vmax.xlane.f32.xlu1 %v281_v27 }
 0x2a5   : > { %v283_v28 = vpop.xlane.xlu1 %282 }
 0x2a6   : > { %vm284_vm4 = vcmp.eq.f32.partialorder %v281_v27, %v283_v28 }
 0x2a7   : > { %v285_v29 = vsel %vm284_vm4, %v257_v10, 4 }
 0x2a8   : > { %v287_v30 = vshra.s32 %v285_v29, 16  ;;  %v286_v32 = vand.u32 65535, %v285_v29 }
 0x2aa   : > { %v289_v31 = vcvt.s32.f32 %v287_v30  ;;  %v288_v34 = vcvt.s32.f32 %v286_v32 }
 0x2ac   : > { %290 = vmin.xlane.f32.xlu2 %v289_v31 }
 0x31f   : > { %v291_v33 = vpop.xlane.xlu2 %290 }
 0x320   : > { %vm292_vm5 = vcmp.eq.f32.partialorder %v289_v31, %v291_v33  ;;  %v297_v36 = vcvt.f32.s32 %v291_v33 }
 0x321   : > { %v293_v35 = vsel %vm292_vm5, %v288_v34, inf }
 0x322   : > { %294 = vmin.xlane.f32.xlu2 %v293_v35  ;;  %v298_v38 = vshll.u32 %v297_v36, 16 }
 0x395   : > { %v295_v37 = vpop.xlane.xlu2 %294 }
 0x396   : > { %v296_v39 = vcvt.f32.s32 %v295_v37 }
 0x398   : > { %v299_v40 = vadd.s32 %v298_v38, %v296_v39 }
 0x39a   : > { %vm300_vm8 = vcmp.gt.s32.totalorder %v279_v41, %v299_v40 }
 0x39b   : > { %v301_v42 = vsel %vm300_vm8, %v279_v41, %v299_v40 }
 0x39c   : > { %303 = vst.msk [vmem:[%s177_s29] sm:$0xff] %vm302_vm7, %v301_v42 }
 0x39d PF: > { %p13_p3 = scmp.ge.s32.totalorder %s637_s22, 4   ;;  %s710_s9 = smov %s573_s10 }
 0x39e   : > { %s711_s10 = smov %s577_s11  ;;  %s712_s11 = smov %s647_s25 }
 0x39f   : > { %s713_s12 = smov %s637_s22  ;;  %15 = sbr.rel (!%p13_p3) target bundleno = 4 (0x4), region = 72 }
 0x3a4   :  { %323 = vsyncpa [#allocation3], 1 }
 0x3a5   :  { %325 = vsyncpa [#allocation3 + $0x1], 1 }
 0x3a6   :  { %326 = vsyncpa [#allocation5], 1 }

</bundles_post_ra>
